<compile_context>
chip_gen: v7x
topology: tpu7x:2x2x1
jax: 0.10.0
libtpu: 0.0.40
codegen_flags: <defaults>
</compile_context>

<pallas_src>
import functools

import jax
import jax.numpy as jnp
import numpy as np
from jax import lax
from jax.experimental import pallas as pl
from jax.experimental.pallas import tpu as pltpu

EPS = 1e-5  # torch.nn.InstanceNorm1d default eps


def softpool_kernel(x_ref, w_ref, g_ref, o_ref, *, rows, seq_len):
    """One batch tile of SoftPool.

    x_ref : (rows, L)        rows = TB*C; row b*C + c = x[b, c, :] (free reshape).
    w_ref : (2*rows, rows)   stacked block-diagonal weight:
                             top = kron(I_TB, W_h), bottom = kron(I_TB, W_a).
    g_ref : (rows, 1)        InstanceNorm gamma tiled per batch element.
    o_ref : (rows, 1)        pooled output column (row b*C + c = out[b, c]).
    """
    x = x_ref[...]                                         # (rows, L) fp32
    w = w_ref[...]                                         # (2*rows, rows) fp32

    # One wide-N MXU matmul for the whole tile: h rows on top, attn logits below.
    y = jnp.dot(w, x, preferred_element_type=jnp.float32,
                precision=lax.Precision.HIGHEST)           # (2*rows, L)
    h = y[:rows, :]                                        # (rows, L)
    a = y[rows:, :]                                        # (rows, L)

    # InstanceNorm over L with a two-pass (numerically robust) biased variance.
    # The mean shift and beta are per-row constants over L -> cancel in softmax.
    inv_l = 1.0 / seq_len
    mean = jnp.sum(a, axis=-1, keepdims=True) * inv_l      # (rows, 1)
    d = a - mean
    var = jnp.sum(d * d, axis=-1, keepdims=True) * inv_l   # biased, as torch
    scale = g_ref[...] * lax.rsqrt(var + EPS)              # (rows, 1)

    # Deferred-division softmax: out = sum(h*e) / sum(e); attn never built.
    z = d * scale
    zmax = jnp.max(z, axis=-1, keepdims=True)
    e = jnp.exp(z - zmax)
    num = jnp.sum(h * e, axis=-1, keepdims=True)           # (rows, 1)
    den = jnp.sum(e, axis=-1, keepdims=True)                # (rows, 1), >= 1

    # EUP reciprocal + one Newton refinement (keeps ~fp32 accuracy, no VPU div).
    r = pl.reciprocal(den, approx=True)
    r = r * (2.0 - den * r)
    o_ref[...] = (num * r).astype(o_ref.dtype)


def _pick_batch_tile(batch, ncha, seq_len, itemsize=4):
    """Batch elements packed per grid step.

    Fill the 8-row fp32 sublane tile (TB*C >= 8 when possible), cap TB*C at
    128 rows and the per-step x slab at ~1 MiB so double-buffering stays far
    inside scoped-VMEM defaults (16 MiB v5e / 32 MiB v6e & v7x) and larger
    problems keep several grid steps (pipelining + both v7x TensorCores).
    """
    rows_cap = max(1, min(128, (1 << 20) // max(1, seq_len * itemsize)))
    tb = max(1, min(batch, -(-8 // ncha), max(1, rows_cap // ncha)))
    while batch % tb:
        tb -= 1
    return max(tb, 1)


def softpool(x_nchw, w, gamma, beta, *, batch_tile=None):
    """x_nchw: (B, C, H, W) fp32; w: (2C, C); gamma/beta: (C,). Returns (B, C)."""
    B, C, H, W = x_nchw.shape
    L = H * W
    del beta  # per-(b,c) additive constant over L: cancels inside the softmax

    tb = batch_tile if batch_tile is not None else _pick_batch_tile(B, C, L)
    if B % tb or ((tb * C) % 8 and tb != B):
        tb = B                       # one full-array block is always layout-legal
    rows = tb * C
    grid_b = B // tb

    # Free reshape (B and C adjacent): no HBM transpose before the kernel.
    x_rows = x_nchw.reshape(B * C, L)

    # Stacked block-diagonal weight: one (2*rows, rows) @ (rows, L) matmul per
    # tile yields all h rows (top half) and attention-logit rows (bottom half).
    eye_tb = jnp.eye(tb, dtype=w.dtype)
    w_stacked = jnp.concatenate(
        [jnp.kron(eye_tb, w[:C, :]), jnp.kron(eye_tb, w[C:, :])], axis=0)
    gamma_rows = jnp.tile(gamma, tb).reshape(rows, 1)

    out_col = pl.pallas_call(
        functools.partial(softpool_kernel, rows=rows, seq_len=L),
        out_shape=jax.ShapeDtypeStruct((B * C, 1), jnp.float32),
        grid_spec=pltpu.PrefetchScalarGridSpec(
            num_scalar_prefetch=0,
            grid=(grid_b,),                         # batch tiles
            in_specs=[
                pl.BlockSpec((rows, L), lambda i: (i, 0)),
                pl.BlockSpec((2 * rows, rows), lambda i: (0, 0)),
                pl.BlockSpec((rows, 1), lambda i: (0, 0)),
            ],
            out_specs=pl.BlockSpec((rows, 1), lambda i: (i, 0)),
        ),
        compiler_params=pltpu.CompilerParams(
            dimension_semantics=("parallel",)),      # shards across v7x TCs
    )(x_rows, w_stacked, gamma_rows)

    # Contiguous reshape only — no transpose, no data movement.
    return out_col.reshape(B, C)


def softpool_ref(x_nchw, w, gamma, beta):
    """Pure-JAX reference mirroring the PyTorch module (including beta)."""
    B, C, H, W = x_nchw.shape
    x = x_nchw.reshape(B, C, H * W)
    y = jnp.einsum("oc,bcl->bol", w, x, precision=lax.Precision.HIGHEST)
    h, a = y[:, :C, :], y[:, C:, :]
    mean = a.mean(-1, keepdims=True)
    var = ((a - mean) ** 2).mean(-1, keepdims=True)
    a_n = (a - mean) / jnp.sqrt(var + EPS)
    a_n = a_n * gamma[None, :, None] + beta[None, :, None]
    attn = jax.nn.softmax(a_n, axis=-1)
    return (h * attn).sum(-1)


if __name__ == "__main__":
    B, C, H, W = 2, 4, 16, 16
    key = jax.random.PRNGKey(0)
    kx, kw, kg, kb = jax.random.split(key, 4)

    x = jax.random.normal(kx, (B, C, H, W), dtype=jnp.float32)

    # Parameters per the module __init__:
    #   Linear(ncha, 2*ncha, bias=False)      -> weight (2C, C)
    #   InstanceNorm1d(ncha, affine=True)     -> gamma (C,), beta (C,)
    # gamma/beta perturbed so the affine path is exercised; beta must cancel
    # out of the attention.
    w = jax.random.normal(kw, (2 * C, C), dtype=jnp.float32) * 0.1
    gamma = 1.0 + 0.1 * jax.random.normal(kg, (C,), dtype=jnp.float32)
    beta = 0.01 * jax.random.normal(kb, (C,), dtype=jnp.float32)

    out = jax.block_until_ready(softpool(x, w, gamma, beta))
    ref = jax.block_until_ready(softpool_ref(x, w, gamma, beta))

    assert out.shape == (B, C), out.shape
    np.testing.assert_allclose(np.asarray(out), np.asarray(ref),
                               rtol=1e-5, atol=1e-5)
    print("KERNEL_OK")
</pallas_src>

<mosaic_0001>
module attributes {stable_mosaic.version = 11 : i64} {
  func.func @softpool_kernel(%arg0: i32, %arg1: memref<8x256xf32, #tpu.memory_space<vmem>>, %arg2: memref<16x8xf32, #tpu.memory_space<vmem>>, %arg3: memref<8x1xf32, #tpu.memory_space<vmem>>, %arg4: memref<8x1xf32, #tpu.memory_space<vmem>>) attributes {dimension_semantics = [#tpu.dimension_semantics<parallel>], iteration_bounds = array<i64: 1>, scalar_prefetch = 0 : i64, scratch_operands = 0 : i64, tpu.core_type = #tpu.core_type<tc>, window_params = [{transform_indices = @transform_0, window_bounds = array<i64: 8, 256>}, {pipeline_mode = #tpu.pipeline_mode<synchronous>, transform_indices = @transform_1, window_bounds = array<i64: 16, 8>}, {pipeline_mode = #tpu.pipeline_mode<synchronous>, transform_indices = @transform_2, window_bounds = array<i64: 8, 1>}, {transform_indices = @transform_3, window_bounds = array<i64: 8, 1>}]} {
    %c0 = arith.constant 0 : index
    %c0_0 = arith.constant 0 : index
    %0 = vector.load %arg1[%c0, %c0_0] : memref<8x256xf32, #tpu.memory_space<vmem>>, vector<8x256xf32>
    %c0_1 = arith.constant 0 : index
    %c0_2 = arith.constant 0 : index
    %1 = vector.load %arg2[%c0_1, %c0_2] : memref<16x8xf32, #tpu.memory_space<vmem>>, vector<16x8xf32>
    %cst = arith.constant dense<0.000000e+00> : vector<16x256xf32>
    %2 = tpu.matmul %1, %0, %cst {dimension_numbers = #tpu.dot_dimension_numbers<[1], [0], [0], [1], [0, 0, 1, 1], [], []>, precision = #tpu.contract_precision<fp32>} : vector<16x8xf32>, vector<8x256xf32>, vector<16x256xf32> -> vector<16x256xf32>
    %3 = vector.extract_strided_slice %2 {offsets = [0, 0], sizes = [8, 256], strides = [1, 1]} : vector<16x256xf32> to vector<8x256xf32>
    %4 = vector.extract_strided_slice %2 {offsets = [8, 0], sizes = [8, 256], strides = [1, 1]} : vector<16x256xf32> to vector<8x256xf32>
    %cst_3 = arith.constant dense<0.000000e+00> : vector<8xf32>
    %5 = vector.multi_reduction <add>, %4, %cst_3 [1] : vector<8x256xf32> to vector<8xf32>
    %6 = vector.shape_cast %5 : vector<8xf32> to vector<8x1xf32>
    %cst_4 = arith.constant 3.906250e-03 : f32
    %7 = vector.broadcast %cst_4 : f32 to vector<8x1xf32>
    %8 = arith.mulf %6, %7 : vector<8x1xf32>
    %9 = vector.broadcast %8 : vector<8x1xf32> to vector<8x256xf32>
    %10 = arith.subf %4, %9 : vector<8x256xf32>
    %11 = arith.mulf %10, %10 : vector<8x256xf32>
    %cst_5 = arith.constant dense<0.000000e+00> : vector<8xf32>
    %12 = vector.multi_reduction <add>, %11, %cst_5 [1] : vector<8x256xf32> to vector<8xf32>
    %13 = vector.shape_cast %12 : vector<8xf32> to vector<8x1xf32>
    %cst_6 = arith.constant 3.906250e-03 : f32
    %14 = vector.broadcast %cst_6 : f32 to vector<8x1xf32>
    %15 = arith.mulf %13, %14 : vector<8x1xf32>
    %c0_7 = arith.constant 0 : index
    %c0_8 = arith.constant 0 : index
    %16 = vector.load %arg3[%c0_7, %c0_8] : memref<8x1xf32, #tpu.memory_space<vmem>>, vector<8x1xf32>
    %cst_9 = arith.constant 9.99999974E-6 : f32
    %17 = vector.broadcast %cst_9 : f32 to vector<8x1xf32>
    %18 = arith.addf %15, %17 : vector<8x1xf32>
    %19 = math.rsqrt %18 : vector<8x1xf32>
    %20 = arith.mulf %16, %19 : vector<8x1xf32>
    %21 = vector.broadcast %20 : vector<8x1xf32> to vector<8x256xf32>
    %22 = arith.mulf %10, %21 : vector<8x256xf32>
    %cst_10 = arith.constant dense<0xFF800000> : vector<8xf32>
    %23 = vector.multi_reduction <maximumf>, %22, %cst_10 [1] : vector<8x256xf32> to vector<8xf32>
    %24 = vector.shape_cast %23 : vector<8xf32> to vector<8x1xf32>
    %25 = vector.broadcast %24 : vector<8x1xf32> to vector<8x256xf32>
    %26 = arith.subf %22, %25 : vector<8x256xf32>
    %27 = math.exp %26 : vector<8x256xf32>
    %28 = arith.mulf %3, %27 : vector<8x256xf32>
    %cst_11 = arith.constant dense<0.000000e+00> : vector<8xf32>
    %29 = vector.multi_reduction <add>, %28, %cst_11 [1] : vector<8x256xf32> to vector<8xf32>
    %30 = vector.shape_cast %29 : vector<8xf32> to vector<8x1xf32>
    %cst_12 = arith.constant dense<0.000000e+00> : vector<8xf32>
    %31 = vector.multi_reduction <add>, %27, %cst_12 [1] : vector<8x256xf32> to vector<8xf32>
    %32 = vector.shape_cast %31 : vector<8xf32> to vector<8x1xf32>
    %33 = tpu.reciprocal %32 {approx = true} : vector<8x1xf32> -> vector<8x1xf32>
    %34 = arith.mulf %32, %33 : vector<8x1xf32>
    %cst_13 = arith.constant 2.000000e+00 : f32
    %35 = vector.broadcast %cst_13 : f32 to vector<8x1xf32>
    %36 = arith.subf %35, %34 : vector<8x1xf32>
    %37 = arith.mulf %33, %36 : vector<8x1xf32>
    %38 = arith.mulf %30, %37 : vector<8x1xf32>
    %c0_14 = arith.constant 0 : index
    %c0_15 = arith.constant 0 : index
    %39 = vector.load %arg4[%c0_14, %c0_15] : memref<8x1xf32, #tpu.memory_space<vmem>>, vector<8x1xf32>
    tpu.vector_store %arg4[%c0_14, %c0_15], %38 {strides = array<i32>} : memref<8x1xf32, #tpu.memory_space<vmem>>, vector<8x1xf32>,
    return
  }
  func.func @transform_0(%arg0: i32) -> (i32, i32) {
    %c0_i32 = arith.constant 0 : i32
    %c0_i32_0 = arith.constant 0 : i32
    return %arg0, %c0_i32 : i32, i32
  }
  func.func @transform_1(%arg0: i32) -> (i32, i32) {
    %c0_i32 = arith.constant 0 : i32
    %c0_i32_0 = arith.constant 0 : i32
    %c0_i32_1 = arith.constant 0 : i32
    return %c0_i32, %c0_i32_0 : i32, i32
  }
  func.func @transform_2(%arg0: i32) -> (i32, i32) {
    %c0_i32 = arith.constant 0 : i32
    %c0_i32_0 = arith.constant 0 : i32
    %c0_i32_1 = arith.constant 0 : i32
    return %c0_i32, %c0_i32_0 : i32, i32
  }
  func.func @transform_3(%arg0: i32) -> (i32, i32) {
    %c0_i32 = arith.constant 0 : i32
    %c0_i32_0 = arith.constant 0 : i32
    return %arg0, %c0_i32 : i32, i32
  }
}

</mosaic_0001>

<bundles_post_ra>
// kernel: tpu_custom_call.1
= control target key start
LH: loop header
LB: loop body
LE: loop exit
PB: predicated region body
PF: predicated region fallthrough
CT: control target
= control target key end

     0   :  { %vm18_vm0 = vcmask 64512   ;;  %v622_v2 = vmov 0.0   ;;  %v623_v47 = vmov 0   ;;  %vm584_vm1 = vcmask 7168   ;;  %s662_s0 = inlined_call_operand.vmem [shape: f32[8,256], index: 0, kind: input, shape index: {}]   ;;  %s663_s1 = inlined_call_operand.vmem [shape: f32[16,8], index: 1, kind: input, shape index: {}]   ;;  %s664_s2 = inlined_call_operand.vmem [shape: f32[8,1], index: 2, kind: input, shape index: {}]   ;;  %s665_s3 = inlined_call_operand.vmem [shape: f32[8,1], index: 3, kind: output, shape index: {}]  }
   0x1   :  { %v15_v0 = vld [vmem:[%s662_s0 + $0x8] sm:$0xff]  ;;  %v14_v1 = vld [vmem:[%s662_s0] sm:$0xff]  ;;  %354 = vmatprep.mubr.f32.mxu0 %v622_v2  ;;  %91 = vmatprep.mubr.f32.mxu1 %v622_v2 }
   0x2   :  { %v16_v3 = vld [vmem:[%s663_s1] sm:$0xff]  ;;  %v25_v4 = vand.u32 4294901760, %v15_v0  ;;  %v27_v5 = vand.u32 4294901760, %v14_v1  ;;  %v17_v7 = vld [vmem:[%s663_s1 + $0x8] sm:$0xff]  ;;  %612 = vset.pattern.permute.xlu1 %v623_v47  ;;  %613 = vset.pattern.permute.xlu0 %v623_v47 }
   0x3   :  { %v20_v6 = vsel %vm18_vm0, %v16_v3, 0  ;;  %v23_v9 = vsel %vm18_vm0, %v17_v7, 0  ;;  %v551_v51 = vld [vmem:[%s664_s2] sm:$0xff] }
   0x4   :  { %v92_v8 = vand.u32 4294901760, %v20_v6  ;;  %289 = vmatprep.subr.mxu0 %v25_v4  ;;  %v121_v10 = vsub.f32 %v14_v1, %v27_v5  ;;  %26 = vmatprep.subr.mxu1 %v25_v4  ;;  %v115_v11 = vsub.f32 %v15_v0, %v25_v4  ;;  %v103_v12 = vand.u32 4294901760, %v23_v9 }
   0x5   :  { %291 = vmatpush1.msra.mxu0 %v27_v5  ;;  %28 = vmatpush1.msra.mxu1 %v27_v5 }
   0x6   :  { %v93_v13 = vsub.f32 %v20_v6, %v92_v8  ;;  %v116_v14 = vand.u32 4294901760, %v115_v11  ;;  %v122_v15 = vand.u32 4294901760, %v121_v10  ;;  %v104_v16 = vsub.f32 %v23_v9, %v103_v12 }
   0x8   :  { %v94_v17 = vand.u32 4294901760, %v93_v13  ;;  %v117_v18 = vsub.f32 %v115_v11, %v116_v14  ;;  %376 = vmatprep.subr.mxu0 %v116_v14  ;;  %v123_v19 = vsub.f32 %v121_v10, %v122_v15  ;;  %v105_v20 = vand.u32 4294901760, %v104_v16 }
   0xa   :  { %358 = vmatmul.mubr.f32.vlgmr.msra.gmra.mrb[0].mxu0 %v94_v17  ;;  %v95_v21 = vsub.f32 %v93_v13, %v94_v17  ;;  %v118_v22 = vand.u32 4294901760, %v117_v18  ;;  %v124_v23 = vand.u32 4294901760, %v123_v19  ;;  %v106_v24 = vsub.f32 %v104_v16, %v105_v20 }
   0xb   :  { %363 = vmatprep.mubr.f32.mxu0 %v622_v2  ;;  %380 = vmatpush1.msra.mxu0 %v122_v15 }
   0xc   :  { %v96_v25 = vand.u32 4294901760, %v95_v21  ;;  %459 = vmatprep.subr.mxu0 %v25_v4  ;;  %119 = vmatprep.subr.mxu1 %v118_v22  ;;  %v107_v26 = vand.u32 4294901760, %v106_v24 }
   0xe   :  { %97 = vmatmul.mubr.f32.vlgmr.msra.gmra.mrb[0].mxu1 %v96_v25  ;;  %367 = vmatmul.mubr.f32.gmra.mrb[2].mxu0 %v105_v20 }
   0xf   :  { %125 = vmatpush1.msra.mxu1 %v124_v23  ;;  %102 = vmatprep.mubr.f32.mxu1 %v622_v2 }
  0x10   :  { %443 = vmatprep.mubr.f32.mxu0 %v622_v2  ;;  %205 = vmatprep.subr.mxu1 %v115_v11 }
  0x12   :  { %108 = vmatmul.mubr.f32.gmra.mrb[2].mxu1 %v107_v26  ;;  %445 = vmatmul.mubr.f32.vlgmr.msra.gmra.mrb[0].mxu0 %v92_v8 }
  0x13   :  { %188 = vmatprep.mubr.f32.mxu1 %v622_v2  ;;  %450 = vmatprep.mubr.f32.mxu0 %v622_v2 }
  0x14   :  { %461 = vmatpush1.msra.mxu0 %v27_v5 }
  0x16   :  { %190 = vmatmul.mubr.f32.vlgmr.msra.gmra.mrb[0].mxu1 %v92_v8  ;;  %452 = vmatmul.mubr.f32.gmra.mrb[2].mxu0 %v103_v12 }
  0x17   :  { %208 = vmatpush1.msra.mxu1 %v121_v10  ;;  %195 = vmatprep.mubr.f32.mxu1 %v622_v2 }
  0x18   :  { %524 = vmatprep.mubr.f32.mxu0 %v622_v2 }
  0x1a   :  { %197 = vmatmul.mubr.f32.gmra.mrb[2].mxu1 %v103_v12  ;;  %526 = vmatmul.mubr.f32.vlgmr.msra.gmra.mrb[0].mxu0 %v92_v8 }
  0x1b   :  { %271 = vmatprep.mubr.f32.mxu1 %v622_v2  ;;  %531 = vmatprep.mubr.f32.mxu0 %v622_v2 }
  0x1e   :  { %274 = vmatmul.mubr.f32.vlgmr.msra.gmra.mrb[0].mxu1 %v93_v13  ;;  %533 = vmatmul.mubr.f32.gmra.mrb[2].mxu0 %v103_v12 }
  0x1f   :  { %279 = vmatprep.mubr.f32.mxu1 %v622_v2 }
  0x22   :  { %282 = vmatmul.mubr.f32.gmra.mrb[2].mxu1 %v104_v16 }
  0xed   :  { %v527_v27 = vpop.f32.mrb[0].mxu0 }
  0xee   :  { %v529_v28 = vpop.f32.mrb[1].mxu0 }
  0xf1   :  { %v275_v29 = vpop.f32.mrb[0].mxu1  ;;  %v534_v30 = vpop.f32.mrb[2].mxu0 }
  0xf2   :  { %v590_v31 = vadd.f32 %v527_v27, %v275_v29  ;;  %v277_v32 = vpop.f32.mrb[1].mxu1  ;;  %v536_v33 = vpop.f32.mrb[3].mxu0 }
  0xf3   :  { %v591_v34 = vadd.f32 %v529_v28, %v277_v32 }
  0xf5   :  { %v283_v35 = vpop.f32.mrb[2].mxu1 }
  0xf6   :  { %v592_v36 = vadd.f32 %v534_v30, %v283_v35  ;;  %v285_v37 = vpop.f32.mrb[3].mxu1 }
  0xf7   :  { %v593_v38 = vadd.f32 %v536_v33, %v285_v37 }
  0xf9   :  { %v539_v39 = vadd.f32 %v593_v38, %v592_v36 }
  0xfb   :  { %540 = vadd.xlane.f32.xlu0 %v539_v39 }
 0x188   :  { %v541_v40 = vpop.xlane.xlu0 %540 }
 0x189   :  { %v542_v41 = vmul.f32 0.00390625, %v541_v40 }
 0x18b   :  { %v543_v42 = vsub.f32 %v592_v36, %v542_v41  ;;  %v544_v43 = vsub.f32 %v593_v38, %v542_v41 }
 0x18d   :  { %v545_v44 = vmul.f32 %v543_v42, %v543_v42  ;;  %v546_v45 = vmul.f32 %v544_v43, %v544_v43 }
 0x18f   :  { %v547_v46 = vadd.f32 %v546_v45, %v545_v44 }
 0x191   :  { %548 = vadd.xlane.f32.xlu0 %v547_v46 }
 0x21e   :  { %v549_v48 = vpop.xlane.xlu0 %548 }
 0x21f   :  { %v550_v49 = vmul.f32 0.00390625, %v549_v48 }
 0x221   :  { %v552_v50 = vadd.f32 1e-05, %v550_v49 }
 0x223   :  { %614 = vrsqrt.f32 %v552_v50 }
 0x22d   :  { %v615_v52 = vpop.eup %614 }
 0x22e   :  { %v554_v53 = vmul.f32 %v615_v52, %v551_v51 }
 0x230   :  { %557 = vperm.xlu1 %612, %v554_v53  }
 0x2af   :  { %v558_v54 = vpop.permute.xlu1 %557 }
 0x2b0   :  { %v560_v55 = vmul.f32 %v558_v54, %v543_v42  ;;  %v561_v56 = vmul.f32 %v558_v54, %v544_v43 }
 0x2b2   :  { %v562_v57 = vmax.f32 %v560_v55, %v561_v56 }
 0x2b4   :  { %563 = vmax.xlane.f32.xlu1 %v562_v57 }
 0x341   :  { %v564_v58 = vpop.xlane.xlu1 %563 }
 0x342   :  { %v565_v59 = vsub.f32 %v560_v55, %v564_v58  ;;  %v566_v60 = vsub.f32 %v561_v56, %v564_v58 }
 0x344   :  { %v567_v61 = vmul.f32 1.442695, %v565_v59  ;;  %v569_v62 = vmul.f32 1.442695, %v566_v60 }
 0x346   :  { %616 = vpow2.f32 %v567_v61 }
 0x347   :  { %618 = vpow2.f32 %v569_v62 }
 0x350   :  { %v617_v63 = vpop.eup %616 }
 0x351   :  { %v619_v0 = vpop.eup %618  ;;  %v571_v1 = vmul.f32 %v617_v63, %v590_v31 }
 0x352   :  { %v576_v2 = vadd.f32 %v619_v0, %v617_v63  ;;  %v572_v3 = vmul.f32 %v619_v0, %v591_v34 }
 0x354   :  { %577 = vadd.xlane.f32.xlu0 %v576_v2  ;;  %v573_v4 = vadd.f32 %v572_v3, %v571_v1 }
 0x358   :  { %574 = vadd.xlane.f32.xlu0 %v573_v4 }
 0x3e1   :  { %v578_v5 = vpop.xlane.xlu0 %577 }
 0x3e2   :  { %620 = vrcp.f32 %v578_v5 }
 0x3e5   :  { %v575_v10 = vpop.xlane.xlu0 %574 }
 0x3ec   :  { %v621_v6 = vpop.eup %620 }
 0x3ed   :  { %v580_v7 = vmul.f32 %v621_v6, %v578_v5 }
 0x3ef   :  { %v581_v8 = vsub.f32 2.0, %v580_v7 }
 0x3f1   :  { %v582_v9 = vmul.f32 %v621_v6, %v581_v8 }
 0x3f3   :  { %v583_v11 = vmul.f32 %v582_v9, %v575_v10 }
 0x3f5   :  { %585 = vst.msk [vmem:[%s665_s3] sm:$0xff] %vm584_vm1, %v583_v11 }

</bundles_post_ra>
